<compile_context>
chip_gen: v6e
topology: v6e:2x2x1
jax: 0.10.0
libtpu: 0.0.40
codegen_flags: <defaults>
</compile_context>

<pallas_src>
import jax
import jax.numpy as jnp
from jax.experimental import pallas as pl
from jax.experimental.pallas import tpu as pltpu


def _round_up(x, m):
    return ((x + m - 1) // m) * m


def _rn_vanilla_kernel(x_ref, w1_ref, b1_ref, w2_ref, b2_ref, o_ref):
    # fc1: (tm, D)bf16 @ (D, H)bf16 -> f32 accumulation on the MXU
    h = jnp.dot(x_ref[...], w1_ref[...], preferred_element_type=jnp.float32)
    h = h + b1_ref[...]          # bias add in f32
    h = jnp.maximum(h, 0.0)      # ReLU
    # dropout(p=0.6) in eval mode == identity
    # TODO(synk): training-mode dropout (Bernoulli mask via pltpu.prng_*) not wired in.
    # fc2: (tm, H)bf16 @ (H, O)bf16 -> f32
    out = jnp.dot(h.astype(w2_ref.dtype), w2_ref[...],
                  preferred_element_type=jnp.float32)
    out = out + b2_ref[...]
    o_ref[...] = out.astype(o_ref.dtype)


def _call_kernel(xb, w1b, b1_2d, w2b, b2_2d, block_m, *, single_buffer_weights):
    Bp, D = xb.shape
    H = w1b.shape[1]
    O = w2b.shape[1]
    grid = (Bp // block_m,)

    # Resident operands (constant index_map) only need one buffer.
    wmode = dict(pipeline_mode=pl.Buffered(1)) if single_buffer_weights else {}

    in_specs = [
        pl.BlockSpec((block_m, D), lambda i: (i, 0)),      # x tile (streamed)
        pl.BlockSpec((D, H), lambda i: (0, 0), **wmode),   # W1^T (resident)
        pl.BlockSpec((1, H), lambda i: (0, 0), **wmode),   # b1
        pl.BlockSpec((H, O), lambda i: (0, 0), **wmode),   # W2^T (resident)
        pl.BlockSpec((1, O), lambda i: (0, 0), **wmode),   # b2
    ]
    out_specs = pl.BlockSpec((block_m, O), lambda i: (i, 0))

    # VMEM budget: resident bf16 weights + f32 biases + double-buffered x/out tiles.
    wbuf = 1 if single_buffer_weights else 2
    est_vmem = (wbuf * (D * H + H * O) * 2      # bf16 weights
                + wbuf * (H + O) * 4            # f32 biases
                + 2 * block_m * D * 2           # bf16 x tiles (2x buffered)
                + 2 * block_m * O * 4)          # f32 out tiles (2x buffered)
    vmem_limit = int(min(max(2 * est_vmem, 16 << 20), 48 << 20))

    cost = pl.CostEstimate(
        flops=2 * Bp * (D * H + H * O),
        transcendentals=0,
        bytes_accessed=(Bp * D * 2 + D * H * 2 + H * O * 2
                        + (H + O) * 4 + Bp * O * 4),
    )

    fn = pl.pallas_call(
        _rn_vanilla_kernel,
        out_shape=jax.ShapeDtypeStruct((Bp, O), jnp.float32),
        grid_spec=pltpu.PrefetchScalarGridSpec(
            num_scalar_prefetch=0,
            grid=grid,
            in_specs=in_specs,
            out_specs=out_specs,
        ),
        compiler_params=pltpu.CompilerParams(
            dimension_semantics=("parallel",),
            vmem_limit_bytes=vmem_limit,
        ),
        cost_estimate=cost,
    )
    return fn(xb, w1b, b1_2d, w2b, b2_2d)


def rn_vanilla_forward(x, w1_t, b1, w2_t, b2, *, block_m=256):
    """Fused fc1 -> ReLU -> (eval) dropout -> fc2.

    x: (B, D) f32; w1_t: (D, 512); b1: (512,); w2_t: (512, 128); b2: (128,).
    Returns (B, 128) f32. Weights are pre-transposed to (in, out) so the
    kernel computes plain x @ W on the MXU.
    """
    B, _ = x.shape
    H = w1_t.shape[1]
    O = w2_t.shape[1]

    # MXU-friendly batch tile; pad the batch to a multiple of it (no divisibility assert).
    bm = min(block_m, _round_up(B, 8))
    # Keep >= 2 grid steps when possible so v7x can shard across its 2 TensorCores.
    if bm >= 256 and pl.cdiv(B, bm) < 2:
        bm = _round_up(bm // 2, 8)
    Bp = _round_up(B, bm)

    xb = x.astype(jnp.bfloat16)
    if Bp != B:
        xb = jnp.pad(xb, ((0, Bp - B), (0, 0)))

    w1b = w1_t.astype(jnp.bfloat16)
    w2b = w2_t.astype(jnp.bfloat16)
    b1_2d = b1.reshape(1, H).astype(jnp.float32)
    b2_2d = b2.reshape(1, O).astype(jnp.float32)

    try:
        out = _call_kernel(xb, w1b, b1_2d, w2b, b2_2d, bm,
                           single_buffer_weights=True)
    except Exception:
        # TODO(synk): pl.Buffered(1) (single-buffered resident weights) rejected by
        # this JAX version; fall back to default double-buffering.
        out = _call_kernel(xb, w1b, b1_2d, w2b, b2_2d, bm,
                           single_buffer_weights=False)
    return out[:B] if Bp != B else out


def init_params(key, input_dim, hidden=512, out=128, dtype=jnp.float32):
    """Deterministic init mirroring the PyTorch module's __init_weight."""
    k1, k2, k3, k4 = jax.random.split(key, 4)
    # xavier_normal_: std = sqrt(2 / (fan_in + fan_out))
    std1 = (2.0 / (input_dim + hidden)) ** 0.5
    std2 = (2.0 / (hidden + out)) ** 0.5
    # PyTorch weight shape is (out, in); we store the transpose (in, out).
    w1_t = jax.random.normal(k1, (input_dim, hidden), dtype) * std1
    w2_t = jax.random.normal(k2, (hidden, out), dtype) * std2
    # nn.Linear default bias init: U(-1/sqrt(fan_in), 1/sqrt(fan_in))
    bound1 = 1.0 / (input_dim ** 0.5)
    bound2 = 1.0 / (hidden ** 0.5)
    b1 = jax.random.uniform(k3, (hidden,), dtype, -bound1, bound1)
    b2 = jax.random.uniform(k4, (out,), dtype, -bound2, bound2)
    return w1_t, b1, w2_t, b2


if __name__ == "__main__":
    key = jax.random.PRNGKey(0)
    kx, kp = jax.random.split(key)

    # Small, shape-consistent instance (module default input_dim is 4096).
    # B=10 intentionally non-multiple-of-8 to exercise the padded-tail path.
    B, D = 10, 256
    x = jax.random.normal(kx, (B, D), jnp.float32)
    w1_t, b1, w2_t, b2 = init_params(kp, input_dim=D)

    out = rn_vanilla_forward(x, w1_t, b1, w2_t, b2)
    out = jax.block_until_ready(out)

    # Plain-JAX reference of the same math (bf16 matmuls, f32 accumulation).
    xb = x.astype(jnp.bfloat16)
    h = jnp.dot(xb, w1_t.astype(jnp.bfloat16),
                preferred_element_type=jnp.float32) + b1
    h = jnp.maximum(h, 0.0)
    ref = jnp.dot(h.astype(jnp.bfloat16), w2_t.astype(jnp.bfloat16),
                  preferred_element_type=jnp.float32) + b2

    assert out.shape == (B, 128), out.shape
    assert jnp.allclose(out, ref, atol=5e-2, rtol=5e-2), "mismatch vs reference"

    print("KERNEL_OK")
</pallas_src>

<mosaic_0001>
module attributes {stable_mosaic.version = 11 : i64} {
  func.func @_rn_vanilla_kernel(%arg0: i32, %arg1: memref<16x256xbf16, #tpu.memory_space<vmem>>, %arg2: memref<256x512xbf16, #tpu.memory_space<vmem>>, %arg3: memref<1x512xf32, #tpu.memory_space<vmem>>, %arg4: memref<512x128xbf16, #tpu.memory_space<vmem>>, %arg5: memref<1x128xf32, #tpu.memory_space<vmem>>, %arg6: memref<16x128xf32, #tpu.memory_space<vmem>>) attributes {dimension_semantics = [#tpu.dimension_semantics<parallel>], iteration_bounds = array<i64: 1>, scalar_prefetch = 0 : i64, scratch_operands = 0 : i64, tpu.core_type = #tpu.core_type<tc>, window_params = [{transform_indices = @transform_0, window_bounds = array<i64: 16, 256>}, {pipeline_mode = #tpu.pipeline_mode<synchronous>, transform_indices = @transform_1, window_bounds = array<i64: 256, 512>}, {pipeline_mode = #tpu.pipeline_mode<synchronous>, transform_indices = @transform_2, window_bounds = array<i64: 1, 512>}, {pipeline_mode = #tpu.pipeline_mode<synchronous>, transform_indices = @transform_3, window_bounds = array<i64: 512, 128>}, {pipeline_mode = #tpu.pipeline_mode<synchronous>, transform_indices = @transform_4, window_bounds = array<i64: 1, 128>}, {transform_indices = @transform_5, window_bounds = array<i64: 16, 128>}]} {
    %c0 = arith.constant 0 : index
    %c0_0 = arith.constant 0 : index
    %0 = vector.load %arg1[%c0, %c0_0] : memref<16x256xbf16, #tpu.memory_space<vmem>>, vector<16x256xbf16>
    %c0_1 = arith.constant 0 : index
    %c0_2 = arith.constant 0 : index
    %1 = vector.load %arg2[%c0_1, %c0_2] : memref<256x512xbf16, #tpu.memory_space<vmem>>, vector<256x512xbf16>
    %cst = arith.constant dense<0.000000e+00> : vector<16x512xf32>
    %2 = tpu.matmul %0, %1, %cst {dimension_numbers = #tpu.dot_dimension_numbers<[1], [0], [0], [1], [0, 0, 1, 1], [], []>} : vector<16x256xbf16>, vector<256x512xbf16>, vector<16x512xf32> -> vector<16x512xf32>
    %c0_3 = arith.constant 0 : index
    %c0_4 = arith.constant 0 : index
    %3 = vector.load %arg3[%c0_3, %c0_4] : memref<1x512xf32, #tpu.memory_space<vmem>>, vector<1x512xf32>
    %4 = vector.broadcast %3 : vector<1x512xf32> to vector<16x512xf32>
    %5 = arith.addf %2, %4 : vector<16x512xf32>
    %cst_5 = arith.constant 0.000000e+00 : f32
    %6 = vector.broadcast %cst_5 : f32 to vector<16x512xf32>
    %7 = arith.maximumf %5, %6 : vector<16x512xf32>
    %8 = arith.truncf %7 : vector<16x512xf32> to vector<16x512xbf16>
    %c0_6 = arith.constant 0 : index
    %c0_7 = arith.constant 0 : index
    %9 = vector.load %arg4[%c0_6, %c0_7] : memref<512x128xbf16, #tpu.memory_space<vmem>>, vector<512x128xbf16>
    %cst_8 = arith.constant dense<0.000000e+00> : vector<16x128xf32>
    %10 = tpu.matmul %8, %9, %cst_8 {dimension_numbers = #tpu.dot_dimension_numbers<[1], [0], [0], [1], [0, 0, 1, 1], [], []>} : vector<16x512xbf16>, vector<512x128xbf16>, vector<16x128xf32> -> vector<16x128xf32>
    %c0_9 = arith.constant 0 : index
    %c0_10 = arith.constant 0 : index
    %11 = vector.load %arg5[%c0_9, %c0_10] : memref<1x128xf32, #tpu.memory_space<vmem>>, vector<1x128xf32>
    %12 = vector.broadcast %11 : vector<1x128xf32> to vector<16x128xf32>
    %13 = arith.addf %10, %12 : vector<16x128xf32>
    %c0_11 = arith.constant 0 : index
    %c0_12 = arith.constant 0 : index
    %14 = vector.load %arg6[%c0_11, %c0_12] : memref<16x128xf32, #tpu.memory_space<vmem>>, vector<16x128xf32>
    tpu.vector_store %arg6[%c0_11, %c0_12], %13 {strides = array<i32>} : memref<16x128xf32, #tpu.memory_space<vmem>>, vector<16x128xf32>,
    return
  }
  func.func @transform_0(%arg0: i32) -> (i32, i32) {
    %c0_i32 = arith.constant 0 : i32
    %c0_i32_0 = arith.constant 0 : i32
    return %arg0, %c0_i32 : i32, i32
  }
  func.func @transform_1(%arg0: i32) -> (i32, i32) {
    %c0_i32 = arith.constant 0 : i32
    %c0_i32_0 = arith.constant 0 : i32
    %c0_i32_1 = arith.constant 0 : i32
    return %c0_i32, %c0_i32_0 : i32, i32
  }
  func.func @transform_2(%arg0: i32) -> (i32, i32) {
    %c0_i32 = arith.constant 0 : i32
    %c0_i32_0 = arith.constant 0 : i32
    %c0_i32_1 = arith.constant 0 : i32
    return %c0_i32, %c0_i32_0 : i32, i32
  }
  func.func @transform_3(%arg0: i32) -> (i32, i32) {
    %c0_i32 = arith.constant 0 : i32
    %c0_i32_0 = arith.constant 0 : i32
    %c0_i32_1 = arith.constant 0 : i32
    return %c0_i32, %c0_i32_0 : i32, i32
  }
  func.func @transform_4(%arg0: i32) -> (i32, i32) {
    %c0_i32 = arith.constant 0 : i32
    %c0_i32_0 = arith.constant 0 : i32
    %c0_i32_1 = arith.constant 0 : i32
    return %c0_i32, %c0_i32_0 : i32, i32
  }
  func.func @transform_5(%arg0: i32) -> (i32, i32) {
    %c0_i32 = arith.constant 0 : i32
    %c0_i32_0 = arith.constant 0 : i32
    return %arg0, %c0_i32 : i32, i32
  }
}

module attributes {stable_mosaic.version = 11 : i64} {
  func.func @_rn_vanilla_kernel(%arg0: i32, %arg1: memref<16x256xbf16, #tpu.memory_space<vmem>>, %arg2: memref<256x512xbf16, #tpu.memory_space<vmem>>, %arg3: memref<1x512xf32, #tpu.memory_space<vmem>>, %arg4: memref<512x128xbf16, #tpu.memory_space<vmem>>, %arg5: memref<1x128xf32, #tpu.memory_space<vmem>>, %arg6: memref<16x128xf32, #tpu.memory_space<vmem>>) attributes {dimension_semantics = [#tpu.dimension_semantics<parallel>], iteration_bounds = array<i64: 1>, scalar_prefetch = 0 : i64, scratch_operands = 0 : i64, tpu.core_type = #tpu.core_type<tc>, window_params = [{transform_indices = @transform_0, window_bounds = array<i64: 16, 256>}, {pipeline_mode = #tpu.pipeline_mode<synchronous>, transform_indices = @transform_1, window_bounds = array<i64: 256, 512>}, {pipeline_mode = #tpu.pipeline_mode<synchronous>, transform_indices = @transform_2, window_bounds = array<i64: 1, 512>}, {pipeline_mode = #tpu.pipeline_mode<synchronous>, transform_indices = @transform_3, window_bounds = array<i64: 512, 128>}, {pipeline_mode = #tpu.pipeline_mode<synchronous>, transform_indices = @transform_4, window_bounds = array<i64: 1, 128>}, {transform_indices = @transform_5, window_bounds = array<i64: 16, 128>}]} {
    %c0 = arith.constant 0 : index
    %c0_0 = arith.constant 0 : index
    %0 = vector.load %arg1[%c0, %c0_0] : memref<16x256xbf16, #tpu.memory_space<vmem>>, vector<16x256xbf16>
    %c0_1 = arith.constant 0 : index
    %c0_2 = arith.constant 0 : index
    %1 = vector.load %arg2[%c0_1, %c0_2] : memref<256x512xbf16, #tpu.memory_space<vmem>>, vector<256x512xbf16>
    %cst = arith.constant dense<0.000000e+00> : vector<16x512xf32>
    %2 = tpu.matmul %0, %1, %cst {dimension_numbers = #tpu.dot_dimension_numbers<[1], [0], [0], [1], [0, 0, 1, 1], [], []>} : vector<16x256xbf16>, vector<256x512xbf16>, vector<16x512xf32> -> vector<16x512xf32>
    %c0_3 = arith.constant 0 : index
    %c0_4 = arith.constant 0 : index
    %3 = vector.load %arg3[%c0_3, %c0_4] : memref<1x512xf32, #tpu.memory_space<vmem>>, vector<1x512xf32>
    %4 = vector.broadcast %3 : vector<1x512xf32> to vector<16x512xf32>
    %5 = arith.addf %2, %4 : vector<16x512xf32>
    %cst_5 = arith.constant 0.000000e+00 : f32
    %6 = vector.broadcast %cst_5 : f32 to vector<16x512xf32>
    %7 = arith.maximumf %5, %6 : vector<16x512xf32>
    %8 = arith.truncf %7 : vector<16x512xf32> to vector<16x512xbf16>
    %c0_6 = arith.constant 0 : index
    %c0_7 = arith.constant 0 : index
    %9 = vector.load %arg4[%c0_6, %c0_7] : memref<512x128xbf16, #tpu.memory_space<vmem>>, vector<512x128xbf16>
    %cst_8 = arith.constant dense<0.000000e+00> : vector<16x128xf32>
    %10 = tpu.matmul %8, %9, %cst_8 {dimension_numbers = #tpu.dot_dimension_numbers<[1], [0], [0], [1], [0, 0, 1, 1], [], []>} : vector<16x512xbf16>, vector<512x128xbf16>, vector<16x128xf32> -> vector<16x128xf32>
    %c0_9 = arith.constant 0 : index
    %c0_10 = arith.constant 0 : index
    %11 = vector.load %arg5[%c0_9, %c0_10] : memref<1x128xf32, #tpu.memory_space<vmem>>, vector<1x128xf32>
    %12 = vector.broadcast %11 : vector<1x128xf32> to vector<16x128xf32>
    %13 = arith.addf %10, %12 : vector<16x128xf32>
    %c0_11 = arith.constant 0 : index
    %c0_12 = arith.constant 0 : index
    %14 = vector.load %arg6[%c0_11, %c0_12] : memref<16x128xf32, #tpu.memory_space<vmem>>, vector<16x128xf32>
    tpu.vector_store %arg6[%c0_11, %c0_12], %13 {strides = array<i32>} : memref<16x128xf32, #tpu.memory_space<vmem>>, vector<16x128xf32>,
    return
  }
  func.func @transform_0(%arg0: i32) -> (i32, i32) {
    %c0_i32 = arith.constant 0 : i32
    %c0_i32_0 = arith.constant 0 : i32
    return %arg0, %c0_i32 : i32, i32
  }
  func.func @transform_1(%arg0: i32) -> (i32, i32) {
    %c0_i32 = arith.constant 0 : i32
    %c0_i32_0 = arith.constant 0 : i32
    %c0_i32_1 = arith.constant 0 : i32
    return %c0_i32, %c0_i32_0 : i32, i32
  }
  func.func @transform_2(%arg0: i32) -> (i32, i32) {
    %c0_i32 = arith.constant 0 : i32
    %c0_i32_0 = arith.constant 0 : i32
    %c0_i32_1 = arith.constant 0 : i32
    return %c0_i32, %c0_i32_0 : i32, i32
  }
  func.func @transform_3(%arg0: i32) -> (i32, i32) {
    %c0_i32 = arith.constant 0 : i32
    %c0_i32_0 = arith.constant 0 : i32
    %c0_i32_1 = arith.constant 0 : i32
    return %c0_i32, %c0_i32_0 : i32, i32
  }
  func.func @transform_4(%arg0: i32) -> (i32, i32) {
    %c0_i32 = arith.constant 0 : i32
    %c0_i32_0 = arith.constant 0 : i32
    %c0_i32_1 = arith.constant 0 : i32
    return %c0_i32, %c0_i32_0 : i32, i32
  }
  func.func @transform_5(%arg0: i32) -> (i32, i32) {
    %c0_i32 = arith.constant 0 : i32
    %c0_i32_0 = arith.constant 0 : i32
    return %arg0, %c0_i32 : i32, i32
  }
}

</mosaic_0001>

<bundles_post_ra>
// kernel: tpu_custom_call.1
= control target key start
LH: loop header
LB: loop body
LE: loop exit
PB: predicated region body
PF: predicated region fallthrough
CT: control target
= control target key end

     0   :  { %10 = vsyncpa [#allocation3], 0  ;;  %s1415_s0 = inlined_call_operand.hbm [shape: bf16[16,256], index: 0, kind: input, shape index: {}]   ;;  %s1416_s1 = inlined_call_operand.hbm [shape: bf16[256,512], index: 1, kind: input, shape index: {}]   ;;  %s1417_s2 = inlined_call_operand.hbm [shape: f32[1,512], index: 2, kind: input, shape index: {}]   ;;  %s1418_s3 = inlined_call_operand.hbm [shape: bf16[512,128], index: 3, kind: input, shape index: {}]   ;;  %s1419_s4 = inlined_call_operand.vmem [shape: f32[1,128], index: 4, kind: input, shape index: {}]   ;;  %s1420_s5 = inlined_call_operand.hbm [shape: f32[16,128], index: 5, kind: output, shape index: {}]  }
   0x1   :  { %11 = vsyncpa [#allocation6], 0 }
   0x2   :  { %12 = vsyncpa [#allocation9], 0 }
   0x3   :  { %13 = vsyncpa [#allocation4], 0  ;;  %s1350_s18 = smov [#allocation5]  }
   0x4   :  { %s31_s19 = sshll.u32 %s1350_s18, 4  ;;  %s32_s19 = int_to_ptr.vmem [resolvable:$true] %s31_s19 }
   0x5   :  { %s1250_s20 = scalar_lea.vmem %s32_s19, 8192  ;;  %p1255_p1 = scmp.lt.s32.totalorder %s32_s19, %s32_s19 }
   0x6   :  { %p1251_p0 = scmp.ne.s32.totalorder %s32_s19, %s1250_s20  ;;  %p1256_p2 = scmp.lt.s32.totalorder %s1250_s20, %s1250_s20 }
   0x8   :  { %p1257_p3 = por %p1256_p2, %p1255_p1 }
   0xa   :  { %p1258_p4 = pnand %p1257_p3, %p1251_p0 }
   0xc   :  { %1261 = shalt.err (!%p1258_p4)
}
   0xd   :  { %s1351_s21 = smov 256   ;;  %s1352_s22 = smov 16  }
   0xe   :  { %37 = dma.hbm_to_vmem [thread:$0]  %s1416_s1, 8192, %s32_s19, [#allocation6], %s1351_s21, %s1351_s21, %s1352_s22  }
   0xf   :  { %s1353_s25 = smov [#allocation2]  }
  0x10   :  { %s19_s26 = sshll.u32 %s1353_s25, 4  ;;  %s20_s26 = int_to_ptr.vmem [resolvable:$true] %s19_s26 }
  0x11   :  { %s1270_s27 = scalar_lea.vmem %s20_s26, 256  ;;  %p1275_p6 = scmp.lt.s32.totalorder %s20_s26, %s20_s26 }
  0x12   :  { %p1271_p5 = scmp.ne.s32.totalorder %s20_s26, %s1270_s27  ;;  %p1276_p7 = scmp.lt.s32.totalorder %s1270_s27, %s1270_s27 }
  0x14   :  { %p1277_p8 = por %p1276_p7, %p1275_p6 }
  0x16   :  { %p1278_p9 = pnand %p1277_p8, %p1271_p5 }
  0x18   :  { %1281 = shalt.err (!%p1278_p9)
}
  0x19   :  { %s1354_s28 = smov 128   ;;  %s1355_s29 = smov 8  }
  0x1a   :  { %25 = dma.hbm_to_vmem [thread:$0]  %s1415_s0, 256, %s20_s26, [#allocation3], %s1354_s28, %s1354_s28, %s1355_s29  }
  0x1b   :  { %s1356_s1 = smov [#allocation7]   ;;  %s1357_s8 = smov [#allocation8]  }
  0x1c   :  { %s44_s7 = sshll.u32 %s1356_s1, 4  ;;  %s53_s9 = sshll.u32 %s1357_s8, 4  ;;  %s45_s7 = int_to_ptr.vmem [resolvable:$true] %s44_s7  ;;  %s54_s9 = int_to_ptr.vmem [resolvable:$true] %s53_s9 }
  0x1d   :  { %s1290_s10 = scalar_lea.vmem %s45_s7, 64  ;;  %p1295_p11 = scmp.lt.s32.totalorder %s45_s7, %s45_s7 }
  0x1e   :  { %p1291_p10 = scmp.ne.s32.totalorder %s45_s7, %s1290_s10  ;;  %p1296_p12 = scmp.lt.s32.totalorder %s1290_s10, %s1290_s10 }
  0x20   :  { %p1297_p13 = por %p1296_p12, %p1295_p11 }
  0x22   :  { %p1298_p0 = pnand %p1297_p13, %p1291_p10 }
  0x24   :  { %1301 = shalt.err (!%p1298_p0)
}
  0x25   :  { %47 = dma.hbm_to_vmem [thread:$0]  %s1417_s2, 64, %s45_s7, [#allocation6]  }
  0x26   :  { %s1310_s13 = scalar_lea.vmem %s54_s9, 4096  ;;  %p1315_p2 = scmp.lt.s32.totalorder %s54_s9, %s54_s9 }
  0x27   :  { %p1311_p1 = scmp.ne.s32.totalorder %s54_s9, %s1310_s13  ;;  %p1316_p3 = scmp.lt.s32.totalorder %s1310_s13, %s1310_s13 }
  0x29   :  { %p1317_p4 = por %p1316_p3, %p1315_p2 }
  0x2b   :  { %p1318_p5 = pnand %p1317_p4, %p1311_p1 }
  0x2d   :  { %1321 = shalt.err (!%p1318_p5)
}
  0x2e   :  { %s1358_s0 = smov 64   ;;  %s1359_s14 = smov 4  }
  0x2f   :  { %59 = dma.hbm_to_vmem [thread:$0]  %s1418_s3, 4096, %s54_s9, [#allocation9], %s1358_s0, %s1358_s0, %s1359_s14  }
  0x30   :  { %1342 = dma.done.wait [#allocation3], 256  }
  0x31   :  { %1343 = vsyncadd [#allocation3], 4294967040 }
  0x32   :  { %1344 = dma.done.wait [#allocation6], 8256  }
  0x33   :  { %1345 = vsyncadd [#allocation6], 4294959040 }
  0x34   :  { %1346 = dma.done.wait [#allocation9], 4096  }
  0x35   :  { %1347 = vsyncadd [#allocation9], 4294963200  ;;  %v1111_v0 = vld [vmem:[#allocation5 + $0xe4] ss:$16 sps:$4 sm:$0xff]   ;;  %v1113_v1 = vld [vmem:[#allocation5 + $0xec] ss:$16 sps:$4 sm:$0xff]  }
  0x36   :  { %493 = vmatprep.subr.bf16.mxu0 %v1111_v0  ;;  %v1115_v2 = vld [vmem:[#allocation5 + $0xe0] ss:$16 sps:$4 sm:$0xff]   ;;  %v1116_v3 = vld [vmem:[#allocation5 + $0xe8] ss:$16 sps:$4 sm:$0xff]   ;;  %536 = vmatprep.subr.bf16.mxu1 %v1113_v1  ;;  %v1117_v4 = vld [vmem:[#allocation5 + $0xc4] ss:$16 sps:$4 sm:$0xff]  }
  0x37   :  { %494 = vmatpush1.bf16.msra.mxu0 %v1115_v2  ;;  %537 = vmatpush1.bf16.msra.mxu1 %v1116_v3  ;;  %v1119_v5 = vld [vmem:[#allocation5 + $0xcc] ss:$16 sps:$4 sm:$0xff]   ;;  %v1121_v6 = vld [vmem:[#allocation5 + $0xc0] ss:$16 sps:$4 sm:$0xff]   ;;  %v1122_v7 = vld [vmem:[#allocation5 + $0xc8] ss:$16 sps:$4 sm:$0xff]  }
  0x38   :  { %495 = vmatprep.subr.bf16.mxu0 %v1117_v4  ;;  %538 = vmatprep.subr.bf16.mxu1 %v1119_v5  ;;  %v1123_v8 = vld [vmem:[#allocation5 + $0xa4] ss:$16 sps:$4 sm:$0xff]   ;;  %v1125_v9 = vld [vmem:[#allocation5 + $0xac] ss:$16 sps:$4 sm:$0xff]   ;;  %v1127_v10 = vld [vmem:[#allocation5 + $0xa0] ss:$16 sps:$4 sm:$0xff]  }
  0x39   :  { %v1128_v11 = vld [vmem:[#allocation5 + $0xa8] ss:$16 sps:$4 sm:$0xff]   ;;  %v1129_v12 = vld [vmem:[#allocation5 + $0x84] ss:$16 sps:$4 sm:$0xff]   ;;  %v1131_v13 = vld [vmem:[#allocation5 + $0x8c] ss:$16 sps:$4 sm:$0xff]  }
  0x3a   :  { %v1133_v14 = vld [vmem:[#allocation5 + $0x80] ss:$16 sps:$4 sm:$0xff]   ;;  %v1134_v15 = vld [vmem:[#allocation5 + $0x88] ss:$16 sps:$4 sm:$0xff]   ;;  %v1135_v16 = vld [vmem:[#allocation5 + $0x64] ss:$16 sps:$4 sm:$0xff]  }
  0x3b   :  { %496 = vmatpush1.bf16.msra.mxu0 %v1121_v6  ;;  %539 = vmatpush1.bf16.msra.mxu1 %v1122_v7  ;;  %v1137_v17 = vld [vmem:[#allocation5 + $0x6c] ss:$16 sps:$4 sm:$0xff]   ;;  %v1139_v18 = vld [vmem:[#allocation5 + $0x60] ss:$16 sps:$4 sm:$0xff]   ;;  %v1140_v19 = vld [vmem:[#allocation5 + $0x68] ss:$16 sps:$4 sm:$0xff]  }
  0x3c   :  { %497 = vmatprep.subr.bf16.mxu0 %v1123_v8  ;;  %540 = vmatprep.subr.bf16.mxu1 %v1125_v9  ;;  %v1141_v20 = vld [vmem:[#allocation5 + $0x44] ss:$16 sps:$4 sm:$0xff]   ;;  %v1143_v21 = vld [vmem:[#allocation5 + $0x4c] ss:$16 sps:$4 sm:$0xff]   ;;  %v1145_v22 = vld [vmem:[#allocation5 + $0x40] ss:$16 sps:$4 sm:$0xff]  }
  0x3d   :  { %v1146_v23 = vld [vmem:[#allocation5 + $0x48] ss:$16 sps:$4 sm:$0xff]   ;;  %v1147_v24 = vld [vmem:[#allocation5 + $0x24] ss:$16 sps:$4 sm:$0xff]   ;;  %v1149_v25 = vld [vmem:[#allocation5 + $0x2c] ss:$16 sps:$4 sm:$0xff]  }
  0x3e   :  { %v1151_v26 = vld [vmem:[#allocation5 + $0x20] ss:$16 sps:$4 sm:$0xff]   ;;  %v1152_v27 = vld [vmem:[#allocation5 + $0x28] ss:$16 sps:$4 sm:$0xff]   ;;  %v1153_v28 = vld [vmem:[#allocation5 + $0x4] ss:$16 sps:$4 sm:$0xff]  }
  0x3f   :  { %498 = vmatpush1.bf16.msra.mxu0 %v1127_v10  ;;  %541 = vmatpush1.bf16.msra.mxu1 %v1128_v11  ;;  %v1155_v29 = vld [vmem:[#allocation5 + $0xc] ss:$16 sps:$4 sm:$0xff]   ;;  %v1157_v30 = vld [vmem:[#allocation5] ss:$16 sps:$4 sm:$0xff]   ;;  %v1158_v31 = vld [vmem:[#allocation5 + $0x8] ss:$16 sps:$4 sm:$0xff]  }
  0x40   :  { %499 = vmatprep.subr.bf16.mxu0 %v1129_v12  ;;  %542 = vmatprep.subr.bf16.mxu1 %v1131_v13  ;;  %v1159_v32 = vld [vmem:[#allocation5 + $0x1e4] ss:$16 sps:$4 sm:$0xff]   ;;  %v1161_v33 = vld [vmem:[#allocation5 + $0x1ec] ss:$16 sps:$4 sm:$0xff]   ;;  %v1163_v34 = vld [vmem:[#allocation5 + $0x1e0] ss:$16 sps:$4 sm:$0xff]  }
  0x41   :  { %v1164_v35 = vld [vmem:[#allocation5 + $0x1e8] ss:$16 sps:$4 sm:$0xff]   ;;  %v1165_v36 = vld [vmem:[#allocation5 + $0x1c4] ss:$16 sps:$4 sm:$0xff]   ;;  %v1167_v37 = vld [vmem:[#allocation5 + $0x1cc] ss:$16 sps:$4 sm:$0xff]  }
  0x42   :  { %v1169_v38 = vld [vmem:[#allocation5 + $0x1c0] ss:$16 sps:$4 sm:$0xff]   ;;  %v1170_v39 = vld [vmem:[#allocation5 + $0x1c8] ss:$16 sps:$4 sm:$0xff]   ;;  %v1171_v40 = vld [vmem:[#allocation5 + $0x1a4] ss:$16 sps:$4 sm:$0xff]  }
  0x43   :  { %500 = vmatpush1.bf16.msra.mxu0 %v1133_v14  ;;  %543 = vmatpush1.bf16.msra.mxu1 %v1134_v15  ;;  %v1173_v41 = vld [vmem:[#allocation5 + $0x1ac] ss:$16 sps:$4 sm:$0xff]   ;;  %v1175_v42 = vld [vmem:[#allocation5 + $0x1a0] ss:$16 sps:$4 sm:$0xff]   ;;  %v1176_v43 = vld [vmem:[#allocation5 + $0x1a8] ss:$16 sps:$4 sm:$0xff]  }
  0x44   :  { %501 = vmatprep.subr.bf16.mxu0 %v1135_v16  ;;  %544 = vmatprep.subr.bf16.mxu1 %v1137_v17  ;;  %v1177_v44 = vld [vmem:[#allocation5 + $0x184] ss:$16 sps:$4 sm:$0xff]   ;;  %v1179_v45 = vld [vmem:[#allocation5 + $0x18c] ss:$16 sps:$4 sm:$0xff]   ;;  %v1181_v46 = vld [vmem:[#allocation5 + $0x180] ss:$16 sps:$4 sm:$0xff]  }
  0x45   :  { %v1182_v47 = vld [vmem:[#allocation5 + $0x188] ss:$16 sps:$4 sm:$0xff]   ;;  %v1209_v48 = vld [vmem:[#allocation2 + $0x4] ss:$8 sps:$4 sm:$0xff]   ;;  %v1187_v51 = vld [vmem:[#allocation5 + $0x160] ss:$16 sps:$4 sm:$0xff]  }
  0x46   :  { %v1183_v49 = vld [vmem:[#allocation5 + $0x164] ss:$16 sps:$4 sm:$0xff]   ;;  %v1185_v50 = vld [vmem:[#allocation5 + $0x16c] ss:$16 sps:$4 sm:$0xff]   ;;  %525 = vmatprep.mubr.bf16.mxu0 %v1209_v48  ;;  %568 = vmatprep.mubr.bf16.mxu1 %v1209_v48  ;;  %v1188_v52 = vld [vmem:[#allocation5 + $0x168] ss:$16 sps:$4 sm:$0xff]  }
  0x47   :  { %502 = vmatpush1.bf16.msra.mxu0 %v1139_v18  ;;  %545 = vmatpush1.bf16.msra.mxu1 %v1140_v19  ;;  %v1189_v53 = vld [vmem:[#allocation5 + $0x144] ss:$16 sps:$4 sm:$0xff]   ;;  %v1191_v54 = vld [vmem:[#allocation5 + $0x14c] ss:$16 sps:$4 sm:$0xff]   ;;  %v1193_v55 = vld [vmem:[#allocation5 + $0x140] ss:$16 sps:$4 sm:$0xff]  }
  0x48   :  { %503 = vmatprep.subr.bf16.mxu0 %v1141_v20  ;;  %546 = vmatprep.subr.bf16.mxu1 %v1143_v21  ;;  %v1194_v56 = vld [vmem:[#allocation5 + $0x148] ss:$16 sps:$4 sm:$0xff]   ;;  %v1195_v57 = vld [vmem:[#allocation5 + $0x124] ss:$16 sps:$4 sm:$0xff]   ;;  %v1197_v58 = vld [vmem:[#allocation5 + $0x12c] ss:$16 sps:$4 sm:$0xff]  }
  0x49   :  { %v1199_v59 = vld [vmem:[#allocation5 + $0x120] ss:$16 sps:$4 sm:$0xff]   ;;  %v1200_v60 = vld [vmem:[#allocation5 + $0x128] ss:$16 sps:$4 sm:$0xff]   ;;  %v1201_v61 = vld [vmem:[#allocation5 + $0x104] ss:$16 sps:$4 sm:$0xff]  }
  0x4a   :  { %v1203_v62 = vld [vmem:[#allocation5 + $0x10c] ss:$16 sps:$4 sm:$0xff]   ;;  %v1205_v63 = vld [vmem:[#allocation5 + $0x100] ss:$16 sps:$4 sm:$0xff]   ;;  %v1206_v0 = vld [vmem:[#allocation5 + $0x108] ss:$16 sps:$4 sm:$0xff]  }
  0x4b   :  { %504 = vmatpush1.bf16.msra.mxu0 %v1145_v22  ;;  %547 = vmatpush1.bf16.msra.mxu1 %v1146_v23  ;;  %v1210_v1 = vld [vmem:[#allocation8 + $0x78] sm:$0xff]   ;;  %v1207_v2 = vld [vmem:[#allocation2] ss:$8 sps:$4 sm:$0xff]   ;;  %v1222_v14 = vld [vmem:[#allocation8 + $0x60] sm:$0xff]   ;;  %s1360_s17 = smov [#allocation10]  }
  0x4c   :  { %505 = vmatprep.subr.bf16.mxu0 %v1147_v24  ;;  %548 = vmatprep.subr.bf16.mxu1 %v1149_v25  ;;  %v1211_v3 = vld [vmem:[#allocation8 + $0xf8] sm:$0xff]   ;;  %v1214_v6 = vld [vmem:[#allocation8 + $0x70] sm:$0xff]   ;;  %v1218_v10 = vld [vmem:[#allocation8 + $0x68] sm:$0xff]   ;;  %s943_s18 = sshll.u32 %s1360_s17, 4  ;;  %s944_s18 = int_to_ptr.vmem [resolvable:$true] %s943_s18 }
  0x4d   :  { %v1212_v4 = vld [vmem:[#allocation8 + $0x38] sm:$0xff]   ;;  %v1215_v7 = vld [vmem:[#allocation8 + $0xf0] sm:$0xff]   ;;  %v1219_v11 = vld [vmem:[#allocation8 + $0xe8] sm:$0xff]   ;;  %p1327_p7 = scmp.lt.s32.totalorder %s944_s18, %s944_s18 }
  0x4e   :  { %v1213_v5 = vld [vmem:[#allocation8 + $0xb8] sm:$0xff]   ;;  %v1216_v8 = vld [vmem:[#allocation8 + $0x30] sm:$0xff]   ;;  %v1220_v12 = vld [vmem:[#allocation8 + $0x28] sm:$0xff]  }
  0x4f   :  { %506 = vmatpush1.bf16.msra.mxu0 %v1151_v26  ;;  %549 = vmatpush1.bf16.msra.mxu1 %v1152_v27  ;;  %v1217_v9 = vld [vmem:[#allocation8 + $0xb0] sm:$0xff]   ;;  %v1221_v13 = vld [vmem:[#allocation8 + $0xa8] sm:$0xff]   ;;  %v1223_v15 = vld [vmem:[#allocation8 + $0xe0] sm:$0xff]  }
  0x50   :  { %507 = vmatprep.subr.bf16.mxu0 %v1153_v28  ;;  %550 = vmatprep.subr.bf16.mxu1 %v1155_v29  ;;  %v1224_v16 = vld [vmem:[#allocation8 + $0x20] sm:$0xff]   ;;  %v1226_v18 = vld [vmem:[#allocation8 + $0x58] sm:$0xff]   ;;  %v1230_v22 = vld [vmem:[#allocation8 + $0x50] sm:$0xff]  }
  0x51   :  { %v1225_v17 = vld [vmem:[#allocation8 + $0xa0] sm:$0xff]   ;;  %v1227_v19 = vld [vmem:[#allocation8 + $0xd8] sm:$0xff]   ;;  %v1231_v23 = vld [vmem:[#allocation8 + $0xd0] sm:$0xff]  }
  0x52   :  { %v1228_v20 = vld [vmem:[#allocation8 + $0x18] sm:$0xff]   ;;  %v1232_v24 = vld [vmem:[#allocation8 + $0x10] sm:$0xff]   ;;  %v1234_v26 = vld [vmem:[#allocation8 + $0x48] sm:$0xff]  }
  0x53   :  { %508 = vmatpush1.bf16.msra.mxu0 %v1157_v30  ;;  %551 = vmatpush1.bf16.msra.mxu1 %v1158_v31  ;;  %v1229_v21 = vld [vmem:[#allocation8 + $0x98] sm:$0xff]   ;;  %v1233_v25 = vld [vmem:[#allocation8 + $0x90] sm:$0xff]   ;;  %v1235_v27 = vld [vmem:[#allocation8 + $0xc8] sm:$0xff]  }
  0x54   :  { %509 = vmatprep.subr.bf16.mxu0 %v1159_v32  ;;  %552 = vmatprep.subr.bf16.mxu1 %v1161_v33  ;;  %v1236_v28 = vld [vmem:[#allocation8 + $0x8] sm:$0xff]   ;;  %v1238_v30 = vld [vmem:[#allocation8 + $0x40] sm:$0xff]  }
  0x55   :  { %v1237_v29 = vld [vmem:[#allocation8 + $0x88] sm:$0xff]   ;;  %v1239_v31 = vld [vmem:[#allocation8 + $0xc0] sm:$0xff]  }
  0x56   :  { %v1240_v32 = vld [vmem:[#allocation8] sm:$0xff]  }
  0x57   :  { %510 = vmatpush2.bf16.msra.mxu0 %v1163_v34  ;;  %553 = vmatpush2.bf16.msra.mxu1 %v1164_v35  ;;  %v1241_v33 = vld [vmem:[#allocation8 + $0x80] sm:$0xff]   ;;  %v143_v34 = vlaneseq }
  0x58   :  { %511 = vmatprep.subr.bf16.mxu0 %v1165_v36  ;;  %554 = vmatprep.subr.bf16.mxu1 %v1167_v37 }
  0x59   :  { %v144_v35 = vshrl.u32 %v143_v34, 7 }
  0x5b   :  { %512 = vmatpush2.bf16.msra.mxu0 %v1169_v38  ;;  %555 = vmatpush2.bf16.msra.mxu1 %v1170_v39  ;;  %v149_v36 = vsub.s32 1, %v144_v35  ;;  %v157_v37 = vsub.s32 3, %v144_v35  ;;  %v145_v38 = vsub.s32 0, %v144_v35  ;;  %v153_v39 = vsub.s32 2, %v144_v35 }
  0x5c   :  { %513 = vmatprep.subr.bf16.mxu0 %v1171_v40  ;;  %556 = vmatprep.subr.bf16.mxu1 %v1173_v41  ;;  %v141_v40 = vld [vmem:[#allocation7] sm:$0xf] }
  0x5f   :  { %514 = vmatpush2.bf16.msra.mxu0 %v1175_v42  ;;  %557 = vmatpush2.bf16.msra.mxu1 %v1176_v43  ;;  %v150_v43 = vrot.slane %v141_v40, %v149_v36 }
  0x60   :  { %515 = vmatprep.subr.bf16.mxu0 %v1177_v44  ;;  %558 = vmatprep.subr.bf16.mxu1 %v1179_v45  ;;  %v158_v44 = vrot.slane %v141_v40, %v157_v37  ;;  %v146_v45 = vrot.slane %v141_v40, %v145_v38 }
  0x63   :  { %516 = vmatpush2.bf16.msra.mxu0 %v1181_v46  ;;  %559 = vmatpush2.bf16.msra.mxu1 %v1182_v47  ;;  %v154_v46 = vrot.slane %v141_v40, %v153_v39 }
  0x64   :  { %517 = vmatprep.subr.bf16.mxu0 %v1183_v49  ;;  %560 = vmatprep.subr.bf16.mxu1 %v1185_v50 }
  0x67   :  { %518 = vmatpush2.bf16.msra.mxu0 %v1187_v51  ;;  %561 = vmatpush2.bf16.msra.mxu1 %v1188_v52 }
  0x68   :  { %519 = vmatprep.subr.bf16.mxu0 %v1189_v53  ;;  %562 = vmatprep.subr.bf16.mxu1 %v1191_v54 }
  0x6b   :  { %520 = vmatpush2.bf16.msra.mxu0 %v1193_v55  ;;  %563 = vmatpush2.bf16.msra.mxu1 %v1194_v56 }
  0x6c   :  { %521 = vmatprep.subr.bf16.mxu0 %v1195_v57  ;;  %564 = vmatprep.subr.bf16.mxu1 %v1197_v58 }
  0x6f   :  { %522 = vmatpush2.bf16.msra.mxu0 %v1199_v59  ;;  %565 = vmatpush2.bf16.msra.mxu1 %v1200_v60 }
  0x70   :  { %523 = vmatprep.subr.bf16.mxu0 %v1201_v61  ;;  %566 = vmatprep.subr.bf16.mxu1 %v1203_v62 }
  0x73   :  { %524 = vmatpush2.bf16.msra.mxu0 %v1205_v63  ;;  %567 = vmatpush2.bf16.msra.mxu1 %v1206_v0 }
  0x74   :  { %1056 = vmatprep.subr.bf16.mxu0 %v1210_v1  ;;  %1078 = vmatprep.subr.bf16.mxu1 %v1211_v3 }
  0x76   :  { %526 = vmatmul.mubr.bf16.vlgmr.msra.gmra.mxu0 %v1207_v2  ;;  %569 = vmatmul.mubr.bf16.vlgmr.msra.gmra.mxu1 %v1207_v2 }
  0x77   :  { %1057 = vmatpush3.bf16.msra.mxu0 %v1212_v4  ;;  %1079 = vmatpush3.bf16.msra.mxu1 %v1213_v5 }
  0x78   :  { %1058 = vmatprep.subr.bf16.mxu0 %v1214_v6  ;;  %1080 = vmatprep.subr.bf16.mxu1 %v1215_v7 }
  0x7b   :  { %1059 = vmatpush3.bf16.msra.mxu0 %v1216_v8  ;;  %1081 = vmatpush3.bf16.msra.mxu1 %v1217_v9 }
  0x7c   :  { %1060 = vmatprep.subr.bf16.mxu0 %v1218_v10  ;;  %1082 = vmatprep.subr.bf16.mxu1 %v1219_v11  ;;  %v1023_v11 = vld [vmem:[%s1419_s4] ss:$0 sm:$0xff]  ;;  %s1322_s4 = scalar_lea.vmem %s944_s18, 256 }
  0x7d   :  { %p1323_p6 = scmp.ne.s32.totalorder %s944_s18, %s1322_s4  ;;  %p1328_p8 = scmp.lt.s32.totalorder %s1322_s4, %s1322_s4 }
  0x7f   :  { %1061 = vmatpush3.bf16.msra.mxu0 %v1220_v12  ;;  %1083 = vmatpush3.bf16.msra.mxu1 %v1221_v13  ;;  %p1329_p9 = por %p1328_p8, %p1327_p7 }
  0x80   :  { %1062 = vmatprep.subr.bf16.mxu0 %v1222_v14  ;;  %1084 = vmatprep.subr.bf16.mxu1 %v1223_v15 }
  0x81   :  { %p1330_p10 = pnand %p1329_p9, %p1323_p6 }
  0x83   :  { %1063 = vmatpush3.bf16.msra.mxu0 %v1224_v16  ;;  %1085 = vmatpush3.bf16.msra.mxu1 %v1225_v17 }
  0x84   :  { %1064 = vmatprep.subr.bf16.mxu0 %v1226_v18  ;;  %1086 = vmatprep.subr.bf16.mxu1 %v1227_v19 }
  0x87   :  { %1065 = vmatpush3.bf16.msra.mxu0 %v1228_v20  ;;  %1087 = vmatpush3.bf16.msra.mxu1 %v1229_v21 }
  0x88   :  { %1066 = vmatprep.subr.bf16.mxu0 %v1230_v22  ;;  %1088 = vmatprep.subr.bf16.mxu1 %v1231_v23 }
  0x8b   :  { %1067 = vmatpush3.bf16.msra.mxu0 %v1232_v24  ;;  %1089 = vmatpush3.bf16.msra.mxu1 %v1233_v25 }
  0x8c   :  { %1068 = vmatprep.subr.bf16.mxu0 %v1234_v26  ;;  %1090 = vmatprep.subr.bf16.mxu1 %v1235_v27 }
  0x8f   :  { %1069 = vmatpush3.bf16.msra.mxu0 %v1236_v28  ;;  %1091 = vmatpush3.bf16.msra.mxu1 %v1237_v29 }
  0x90   :  { %1070 = vmatprep.subr.bf16.mxu0 %v1238_v30  ;;  %1092 = vmatprep.subr.bf16.mxu1 %v1239_v31 }
  0x93   :  { %1071 = vmatpush3.bf16.msra.mxu0 %v1240_v32  ;;  %1093 = vmatpush3.bf16.msra.mxu1 %v1241_v33 }
 0x136   :  { %v527_v41 = vpop.f32.mrf.mxu0  ;;  %v570_v42 = vpop.f32.mrf.mxu1 }
 0x137   :  { %v528_v55 = vadd.f32 %v527_v41, %v146_v45  ;;  %v571_v56 = vadd.f32 %v570_v42, %v154_v46 }
 0x138   :  { %v529_v47 = vpop.f32.mrf.mxu0  ;;  %v572_v48 = vpop.f32.mrf.mxu1 }
 0x139   :  { %v530_v51 = vadd.f32 %v529_v47, %v150_v43  ;;  %v573_v52 = vadd.f32 %v572_v48, %v158_v44  ;;  %v579_v3 = vmax.f32 %v528_v55, 0.0  ;;  %v581_v4 = vmax.f32 %v571_v56, 0.0 }
 0x13a   :  { %v531_v49 = vpop.f32.mrf.mxu0  ;;  %v574_v50 = vpop.f32.mrf.mxu1 }
 0x13b   :  { %v532_v53 = vadd.f32 %v531_v49, %v146_v45  ;;  %v575_v54 = vadd.f32 %v574_v50, %v154_v46  ;;  %v580_v63 = vmax.f32 %v530_v51, 0.0  ;;  %v582_v0 = vmax.f32 %v573_v52, 0.0 }
 0x13c   :  { %v533_v57 = vpop.f32.mrf.mxu0  ;;  %v576_v58 = vpop.f32.mrf.mxu1 }
 0x13d   :  { %v534_v59 = vadd.f32 %v533_v57, %v150_v43  ;;  %v577_v60 = vadd.f32 %v576_v58, %v158_v44  ;;  %v583_v61 = vmax.f32 %v532_v53, 0.0  ;;  %v585_v62 = vmax.f32 %v575_v54, 0.0 }
 0x13f   :  { %v584_v1 = vmax.f32 %v534_v59, 0.0  ;;  %v586_v2 = vmax.f32 %v577_v60, 0.0  ;;  %v587_v7 = vpack.c.bf16 %v583_v61, %v579_v3  ;;  %v589_v8 = vpack.c.bf16 %v585_v62, %v581_v4 }
 0x141   :  { %v588_v5 = vpack.c.bf16 %v584_v1, %v580_v63  ;;  %v590_v6 = vpack.c.bf16 %v586_v2, %v582_v0 }
 0x143   :  { %886 = vmatprep.mubr.bf16.mxu0 %v588_v5  ;;  %927 = vmatprep.mubr.bf16.mxu1 %v590_v6 }
 0x144   :  { %887 = vmatmul.mubr.bf16.vlgmr.msra.gmra.mxu0 %v587_v7  ;;  %928 = vmatmul.mubr.bf16.vlgmr.msra.gmra.mxu1 %v589_v8 }
 0x204   :  { %v1072_v9 = vpop.f32.mrf.mxu0  ;;  %v1094_v10 = vpop.f32.mrf.mxu1 }
 0x206   :  { %v1073_v12 = vpop.f32.mrf.mxu0  ;;  %v1095_v13 = vpop.f32.mrf.mxu1 }
 0x207   :  { %v1074_v14 = vadd.f32 %v1073_v12, %v1072_v9  ;;  %v1096_v18 = vadd.f32 %v1095_v13, %v1094_v10 }
 0x208   :  { %v1075_v15 = vpop.f32.mrf.mxu0  ;;  %v1097_v16 = vpop.f32.mrf.mxu1 }
 0x209   :  { %v889_v17 = vadd.f32 %v1074_v14, %v1023_v11 }
 0x20a   :  { %v1076_v19 = vpop.f32.mrf.mxu0  ;;  %v1098_v20 = vpop.f32.mrf.mxu1 }
 0x20b   :  { %v930_v21 = vadd.f32 %v1096_v18, %v889_v17  ;;  %v1077_v22 = vadd.f32 %v1076_v19, %v1075_v15  ;;  %v1099_v24 = vadd.f32 %v1098_v20, %v1097_v16 }
 0x20d   :  { %936 = vst [vmem:[#allocation10] sm:$0xff] %v930_v21  ;;  %v892_v23 = vadd.f32 %v1077_v22, %v1023_v11 }
 0x20f   :  { %v933_v25 = vadd.f32 %v1099_v24, %v892_v23 }
 0x211   :  { %937 = vst [vmem:[#allocation10 + $0x8] sm:$0xff] %v933_v25 }
 0x212   :  { %1333 = shalt.err (!%p1330_p10)
}
 0x213   :  { %949 = dma.vmem_to_hbm [thread:$0]  %s944_s18, 256, %s1420_s5, [#allocation4], %s1354_s28, %s1354_s28, %s1355_s29  }
 0x214   :  { %1348 = dma.done.wait [#allocation4], 256  }
 0x215   :  { %1349 = vsyncadd [#allocation4], 4294967040 }
 0x216   :  { %953 = vsyncpa [#allocation3], 1 }
 0x217   :  { %954 = vsyncpa [#allocation6], 1 }
 0x218   :  { %955 = vsyncpa [#allocation9], 1 }
 0x219   :  { %956 = vsyncpa [#allocation4], 1 }

// kernel: tpu_custom_call.1
= control target key start
LH: loop header
LB: loop body
LE: loop exit
PB: predicated region body
PF: predicated region fallthrough
CT: control target
= control target key end

     0   :  { %10 = vsyncpa [#allocation3], 0  ;;  %s1415_s0 = inlined_call_operand.hbm [shape: bf16[16,256], index: 0, kind: input, shape index: {}]   ;;  %s1416_s1 = inlined_call_operand.hbm [shape: bf16[256,512], index: 1, kind: input, shape index: {}]   ;;  %s1417_s2 = inlined_call_operand.hbm [shape: f32[1,512], index: 2, kind: input, shape index: {}]   ;;  %s1418_s3 = inlined_call_operand.hbm [shape: bf16[512,128], index: 3, kind: input, shape index: {}]   ;;  %s1419_s4 = inlined_call_operand.vmem [shape: f32[1,128], index: 4, kind: input, shape index: {}]   ;;  %s1420_s5 = inlined_call_operand.hbm [shape: f32[16,128], index: 5, kind: output, shape index: {}]  }
   0x1   :  { %11 = vsyncpa [#allocation6], 0 }
   0x2   :  { %12 = vsyncpa [#allocation9], 0 }
   0x3   :  { %13 = vsyncpa [#allocation4], 0  ;;  %s1350_s18 = smov [#allocation5]  }
   0x4   :  { %s31_s19 = sshll.u32 %s1350_s18, 4  ;;  %s32_s19 = int_to_ptr.vmem [resolvable:$true] %s31_s19 }
   0x5   :  { %s1250_s20 = scalar_lea.vmem %s32_s19, 8192  ;;  %p1255_p1 = scmp.lt.s32.totalorder %s32_s19, %s32_s19 }
   0x6   :  { %p1251_p0 = scmp.ne.s32.totalorder %s32_s19, %s1250_s20  ;;  %p1256_p2 = scmp.lt.s32.totalorder %s1250_s20, %s1250_s20 }
   0x8   :  { %p1257_p3 = por %p1256_p2, %p1255_p1 }
   0xa   :  { %p1258_p4 = pnand %p1257_p3, %p1251_p0 }
   0xc   :  { %1261 = shalt.err (!%p1258_p4)
}
   0xd   :  { %s1351_s21 = smov 256   ;;  %s1352_s22 = smov 16  }
   0xe   :  { %37 = dma.hbm_to_vmem [thread:$0]  %s1416_s1, 8192, %s32_s19, [#allocation6], %s1351_s21, %s1351_s21, %s1352_s22  }
   0xf   :  { %s1353_s25 = smov [#allocation2]  }
  0x10   :  { %s19_s26 = sshll.u32 %s1353_s25, 4  ;;  %s20_s26 = int_to_ptr.vmem [resolvable:$true] %s19_s26 }
  0x11   :  { %s1270_s27 = scalar_lea.vmem %s20_s26, 256  ;;  %p1275_p6 = scmp.lt.s32.totalorder %s20_s26, %s20_s26 }
  0x12   :  { %p1271_p5 = scmp.ne.s32.totalorder %s20_s26, %s1270_s27  ;;  %p1276_p7 = scmp.lt.s32.totalorder %s1270_s27, %s1270_s27 }
  0x14   :  { %p1277_p8 = por %p1276_p7, %p1275_p6 }
  0x16   :  { %p1278_p9 = pnand %p1277_p8, %p1271_p5 }
  0x18   :  { %1281 = shalt.err (!%p1278_p9)
}
  0x19   :  { %s1354_s28 = smov 128   ;;  %s1355_s29 = smov 8  }
  0x1a   :  { %25 = dma.hbm_to_vmem [thread:$0]  %s1415_s0, 256, %s20_s26, [#allocation3], %s1354_s28, %s1354_s28, %s1355_s29  }
  0x1b   :  { %s1356_s1 = smov [#allocation7]   ;;  %s1357_s8 = smov [#allocation8]  }
  0x1c   :  { %s44_s7 = sshll.u32 %s1356_s1, 4  ;;  %s53_s9 = sshll.u32 %s1357_s8, 4  ;;  %s45_s7 = int_to_ptr.vmem [resolvable:$true] %s44_s7  ;;  %s54_s9 = int_to_ptr.vmem [resolvable:$true] %s53_s9 }
  0x1d   :  { %s1290_s10 = scalar_lea.vmem %s45_s7, 64  ;;  %p1295_p11 = scmp.lt.s32.totalorder %s45_s7, %s45_s7 }
  0x1e   :  { %p1291_p10 = scmp.ne.s32.totalorder %s45_s7, %s1290_s10  ;;  %p1296_p12 = scmp.lt.s32.totalorder %s1290_s10, %s1290_s10 }
  0x20   :  { %p1297_p13 = por %p1296_p12, %p1295_p11 }
  0x22   :  { %p1298_p0 = pnand %p1297_p13, %p1291_p10 }
  0x24   :  { %1301 = shalt.err (!%p1298_p0)
}
  0x25   :  { %47 = dma.hbm_to_vmem [thread:$0]  %s1417_s2, 64, %s45_s7, [#allocation6]  }
  0x26   :  { %s1310_s13 = scalar_lea.vmem %s54_s9, 4096  ;;  %p1315_p2 = scmp.lt.s32.totalorder %s54_s9, %s54_s9 }
  0x27   :  { %p1311_p1 = scmp.ne.s32.totalorder %s54_s9, %s1310_s13  ;;  %p1316_p3 = scmp.lt.s32.totalorder %s1310_s13, %s1310_s13 }
  0x29   :  { %p1317_p4 = por %p1316_p3, %p1315_p2 }
  0x2b   :  { %p1318_p5 = pnand %p1317_p4, %p1311_p1 }
  0x2d   :  { %1321 = shalt.err (!%p1318_p5)
}
  0x2e   :  { %s1358_s0 = smov 64   ;;  %s1359_s14 = smov 4  }
  0x2f   :  { %59 = dma.hbm_to_vmem [thread:$0]  %s1418_s3, 4096, %s54_s9, [#allocation9], %s1358_s0, %s1358_s0, %s1359_s14  }
  0x30   :  { %1342 = dma.done.wait [#allocation3], 256  }
  0x31   :  { %1343 = vsyncadd [#allocation3], 4294967040 }
  0x32   :  { %1344 = dma.done.wait [#allocation6], 8256  }
  0x33   :  { %1345 = vsyncadd [#allocation6], 4294959040 }
  0x34   :  { %1346 = dma.done.wait [#allocation9], 4096  }
  0x35   :  { %1347 = vsyncadd [#allocation9], 4294963200  ;;  %v1111_v0 = vld [vmem:[#allocation5 + $0xe4] ss:$16 sps:$4 sm:$0xff]   ;;  %v1113_v1 = vld [vmem:[#allocation5 + $0xec] ss:$16 sps:$4 sm:$0xff]  }
  0x36   :  { %493 = vmatprep.subr.bf16.mxu0 %v1111_v0  ;;  %v1115_v2 = vld [vmem:[#allocation5 + $0xe0] ss:$16 sps:$4 sm:$0xff]   ;;  %v1116_v3 = vld [vmem:[#allocation5 + $0xe8] ss:$16 sps:$4 sm:$0xff]   ;;  %536 = vmatprep.subr.bf16.mxu1 %v1113_v1  ;;  %v1117_v4 = vld [vmem:[#allocation5 + $0xc4] ss:$16 sps:$4 sm:$0xff]  }
  0x37   :  { %494 = vmatpush1.bf16.msra.mxu0 %v1115_v2  ;;  %537 = vmatpush1.bf16.msra.mxu1 %v1116_v3  ;;  %v1119_v5 = vld [vmem:[#allocation5 + $0xcc] ss:$16 sps:$4 sm:$0xff]   ;;  %v1121_v6 = vld [vmem:[#allocation5 + $0xc0] ss:$16 sps:$4 sm:$0xff]   ;;  %v1122_v7 = vld [vmem:[#allocation5 + $0xc8] ss:$16 sps:$4 sm:$0xff]  }
  0x38   :  { %495 = vmatprep.subr.bf16.mxu0 %v1117_v4  ;;  %538 = vmatprep.subr.bf16.mxu1 %v1119_v5  ;;  %v1123_v8 = vld [vmem:[#allocation5 + $0xa4] ss:$16 sps:$4 sm:$0xff]   ;;  %v1125_v9 = vld [vmem:[#allocation5 + $0xac] ss:$16 sps:$4 sm:$0xff]   ;;  %v1127_v10 = vld [vmem:[#allocation5 + $0xa0] ss:$16 sps:$4 sm:$0xff]  }
  0x39   :  { %v1128_v11 = vld [vmem:[#allocation5 + $0xa8] ss:$16 sps:$4 sm:$0xff]   ;;  %v1129_v12 = vld [vmem:[#allocation5 + $0x84] ss:$16 sps:$4 sm:$0xff]   ;;  %v1131_v13 = vld [vmem:[#allocation5 + $0x8c] ss:$16 sps:$4 sm:$0xff]  }
  0x3a   :  { %v1133_v14 = vld [vmem:[#allocation5 + $0x80] ss:$16 sps:$4 sm:$0xff]   ;;  %v1134_v15 = vld [vmem:[#allocation5 + $0x88] ss:$16 sps:$4 sm:$0xff]   ;;  %v1135_v16 = vld [vmem:[#allocation5 + $0x64] ss:$16 sps:$4 sm:$0xff]  }
  0x3b   :  { %496 = vmatpush1.bf16.msra.mxu0 %v1121_v6  ;;  %539 = vmatpush1.bf16.msra.mxu1 %v1122_v7  ;;  %v1137_v17 = vld [vmem:[#allocation5 + $0x6c] ss:$16 sps:$4 sm:$0xff]   ;;  %v1139_v18 = vld [vmem:[#allocation5 + $0x60] ss:$16 sps:$4 sm:$0xff]   ;;  %v1140_v19 = vld [vmem:[#allocation5 + $0x68] ss:$16 sps:$4 sm:$0xff]  }
  0x3c   :  { %497 = vmatprep.subr.bf16.mxu0 %v1123_v8  ;;  %540 = vmatprep.subr.bf16.mxu1 %v1125_v9  ;;  %v1141_v20 = vld [vmem:[#allocation5 + $0x44] ss:$16 sps:$4 sm:$0xff]   ;;  %v1143_v21 = vld [vmem:[#allocation5 + $0x4c] ss:$16 sps:$4 sm:$0xff]   ;;  %v1145_v22 = vld [vmem:[#allocation5 + $0x40] ss:$16 sps:$4 sm:$0xff]  }
  0x3d   :  { %v1146_v23 = vld [vmem:[#allocation5 + $0x48] ss:$16 sps:$4 sm:$0xff]   ;;  %v1147_v24 = vld [vmem:[#allocation5 + $0x24] ss:$16 sps:$4 sm:$0xff]   ;;  %v1149_v25 = vld [vmem:[#allocation5 + $0x2c] ss:$16 sps:$4 sm:$0xff]  }
  0x3e   :  { %v1151_v26 = vld [vmem:[#allocation5 + $0x20] ss:$16 sps:$4 sm:$0xff]   ;;  %v1152_v27 = vld [vmem:[#allocation5 + $0x28] ss:$16 sps:$4 sm:$0xff]   ;;  %v1153_v28 = vld [vmem:[#allocation5 + $0x4] ss:$16 sps:$4 sm:$0xff]  }
  0x3f   :  { %498 = vmatpush1.bf16.msra.mxu0 %v1127_v10  ;;  %541 = vmatpush1.bf16.msra.mxu1 %v1128_v11  ;;  %v1155_v29 = vld [vmem:[#allocation5 + $0xc] ss:$16 sps:$4 sm:$0xff]   ;;  %v1157_v30 = vld [vmem:[#allocation5] ss:$16 sps:$4 sm:$0xff]   ;;  %v1158_v31 = vld [vmem:[#allocation5 + $0x8] ss:$16 sps:$4 sm:$0xff]  }
  0x40   :  { %499 = vmatprep.subr.bf16.mxu0 %v1129_v12  ;;  %542 = vmatprep.subr.bf16.mxu1 %v1131_v13  ;;  %v1159_v32 = vld [vmem:[#allocation5 + $0x1e4] ss:$16 sps:$4 sm:$0xff]   ;;  %v1161_v33 = vld [vmem:[#allocation5 + $0x1ec] ss:$16 sps:$4 sm:$0xff]   ;;  %v1163_v34 = vld [vmem:[#allocation5 + $0x1e0] ss:$16 sps:$4 sm:$0xff]  }
  0x41   :  { %v1164_v35 = vld [vmem:[#allocation5 + $0x1e8] ss:$16 sps:$4 sm:$0xff]   ;;  %v1165_v36 = vld [vmem:[#allocation5 + $0x1c4] ss:$16 sps:$4 sm:$0xff]   ;;  %v1167_v37 = vld [vmem:[#allocation5 + $0x1cc] ss:$16 sps:$4 sm:$0xff]  }
  0x42   :  { %v1169_v38 = vld [vmem:[#allocation5 + $0x1c0] ss:$16 sps:$4 sm:$0xff]   ;;  %v1170_v39 = vld [vmem:[#allocation5 + $0x1c8] ss:$16 sps:$4 sm:$0xff]   ;;  %v1171_v40 = vld [vmem:[#allocation5 + $0x1a4] ss:$16 sps:$4 sm:$0xff]  }
  0x43   :  { %500 = vmatpush1.bf16.msra.mxu0 %v1133_v14  ;;  %543 = vmatpush1.bf16.msra.mxu1 %v1134_v15  ;;  %v1173_v41 = vld [vmem:[#allocation5 + $0x1ac] ss:$16 sps:$4 sm:$0xff]   ;;  %v1175_v42 = vld [vmem:[#allocation5 + $0x1a0] ss:$16 sps:$4 sm:$0xff]   ;;  %v1176_v43 = vld [vmem:[#allocation5 + $0x1a8] ss:$16 sps:$4 sm:$0xff]  }
  0x44   :  { %501 = vmatprep.subr.bf16.mxu0 %v1135_v16  ;;  %544 = vmatprep.subr.bf16.mxu1 %v1137_v17  ;;  %v1177_v44 = vld [vmem:[#allocation5 + $0x184] ss:$16 sps:$4 sm:$0xff]   ;;  %v1179_v45 = vld [vmem:[#allocation5 + $0x18c] ss:$16 sps:$4 sm:$0xff]   ;;  %v1181_v46 = vld [vmem:[#allocation5 + $0x180] ss:$16 sps:$4 sm:$0xff]  }
  0x45   :  { %v1182_v47 = vld [vmem:[#allocation5 + $0x188] ss:$16 sps:$4 sm:$0xff]   ;;  %v1209_v48 = vld [vmem:[#allocation2 + $0x4] ss:$8 sps:$4 sm:$0xff]   ;;  %v1187_v51 = vld [vmem:[#allocation5 + $0x160] ss:$16 sps:$4 sm:$0xff]  }
  0x46   :  { %v1183_v49 = vld [vmem:[#allocation5 + $0x164] ss:$16 sps:$4 sm:$0xff]   ;;  %v1185_v50 = vld [vmem:[#allocation5 + $0x16c] ss:$16 sps:$4 sm:$0xff]   ;;  %525 = vmatprep.mubr.bf16.mxu0 %v1209_v48  ;;  %568 = vmatprep.mubr.bf16.mxu1 %v1209_v48  ;;  %v1188_v52 = vld [vmem:[#allocation5 + $0x168] ss:$16 sps:$4 sm:$0xff]  }
  0x47   :  { %502 = vmatpush1.bf16.msra.mxu0 %v1139_v18  ;;  %545 = vmatpush1.bf16.msra.mxu1 %v1140_v19  ;;  %v1189_v53 = vld [vmem:[#allocation5 + $0x144] ss:$16 sps:$4 sm:$0xff]   ;;  %v1191_v54 = vld [vmem:[#allocation5 + $0x14c] ss:$16 sps:$4 sm:$0xff]   ;;  %v1193_v55 = vld [vmem:[#allocation5 + $0x140] ss:$16 sps:$4 sm:$0xff]  }
  0x48   :  { %503 = vmatprep.subr.bf16.mxu0 %v1141_v20  ;;  %546 = vmatprep.subr.bf16.mxu1 %v1143_v21  ;;  %v1194_v56 = vld [vmem:[#allocation5 + $0x148] ss:$16 sps:$4 sm:$0xff]   ;;  %v1195_v57 = vld [vmem:[#allocation5 + $0x124] ss:$16 sps:$4 sm:$0xff]   ;;  %v1197_v58 = vld [vmem:[#allocation5 + $0x12c] ss:$16 sps:$4 sm:$0xff]  }
  0x49   :  { %v1199_v59 = vld [vmem:[#allocation5 + $0x120] ss:$16 sps:$4 sm:$0xff]   ;;  %v1200_v60 = vld [vmem:[#allocation5 + $0x128] ss:$16 sps:$4 sm:$0xff]   ;;  %v1201_v61 = vld [vmem:[#allocation5 + $0x104] ss:$16 sps:$4 sm:$0xff]  }
  0x4a   :  { %v1203_v62 = vld [vmem:[#allocation5 + $0x10c] ss:$16 sps:$4 sm:$0xff]   ;;  %v1205_v63 = vld [vmem:[#allocation5 + $0x100] ss:$16 sps:$4 sm:$0xff]   ;;  %v1206_v0 = vld [vmem:[#allocation5 + $0x108] ss:$16 sps:$4 sm:$0xff]  }
  0x4b   :  { %504 = vmatpush1.bf16.msra.mxu0 %v1145_v22  ;;  %547 = vmatpush1.bf16.msra.mxu1 %v1146_v23  ;;  %v1210_v1 = vld [vmem:[#allocation8 + $0x78] sm:$0xff]   ;;  %v1207_v2 = vld [vmem:[#allocation2] ss:$8 sps:$4 sm:$0xff]   ;;  %v1222_v14 = vld [vmem:[#allocation8 + $0x60] sm:$0xff]   ;;  %s1360_s17 = smov [#allocation10]  }
  0x4c   :  { %505 = vmatprep.subr.bf16.mxu0 %v1147_v24  ;;  %548 = vmatprep.subr.bf16.mxu1 %v1149_v25  ;;  %v1211_v3 = vld [vmem:[#allocation8 + $0xf8] sm:$0xff]   ;;  %v1214_v6 = vld [vmem:[#allocation8 + $0x70] sm:$0xff]   ;;  %v1218_v10 = vld [vmem:[#allocation8 + $0x68] sm:$0xff]   ;;  %s943_s18 = sshll.u32 %s1360_s17, 4  ;;  %s944_s18 = int_to_ptr.vmem [resolvable:$true] %s943_s18 }
  0x4d   :  { %v1212_v4 = vld [vmem:[#allocation8 + $0x38] sm:$0xff]   ;;  %v1215_v7 = vld [vmem:[#allocation8 + $0xf0] sm:$0xff]   ;;  %v1219_v11 = vld [vmem:[#allocation8 + $0xe8] sm:$0xff]   ;;  %p1327_p7 = scmp.lt.s32.totalorder %s944_s18, %s944_s18 }
  0x4e   :  { %v1213_v5 = vld [vmem:[#allocation8 + $0xb8] sm:$0xff]   ;;  %v1216_v8 = vld [vmem:[#allocation8 + $0x30] sm:$0xff]   ;;  %v1220_v12 = vld [vmem:[#allocation8 + $0x28] sm:$0xff]  }
  0x4f   :  { %506 = vmatpush1.bf16.msra.mxu0 %v1151_v26  ;;  %549 = vmatpush1.bf16.msra.mxu1 %v1152_v27  ;;  %v1217_v9 = vld [vmem:[#allocation8 + $0xb0] sm:$0xff]   ;;  %v1221_v13 = vld [vmem:[#allocation8 + $0xa8] sm:$0xff]   ;;  %v1223_v15 = vld [vmem:[#allocation8 + $0xe0] sm:$0xff]  }
  0x50   :  { %507 = vmatprep.subr.bf16.mxu0 %v1153_v28  ;;  %550 = vmatprep.subr.bf16.mxu1 %v1155_v29  ;;  %v1224_v16 = vld [vmem:[#allocation8 + $0x20] sm:$0xff]   ;;  %v1226_v18 = vld [vmem:[#allocation8 + $0x58] sm:$0xff]   ;;  %v1230_v22 = vld [vmem:[#allocation8 + $0x50] sm:$0xff]  }
  0x51   :  { %v1225_v17 = vld [vmem:[#allocation8 + $0xa0] sm:$0xff]   ;;  %v1227_v19 = vld [vmem:[#allocation8 + $0xd8] sm:$0xff]   ;;  %v1231_v23 = vld [vmem:[#allocation8 + $0xd0] sm:$0xff]  }
  0x52   :  { %v1228_v20 = vld [vmem:[#allocation8 + $0x18] sm:$0xff]   ;;  %v1232_v24 = vld [vmem:[#allocation8 + $0x10] sm:$0xff]   ;;  %v1234_v26 = vld [vmem:[#allocation8 + $0x48] sm:$0xff]  }
  0x53   :  { %508 = vmatpush1.bf16.msra.mxu0 %v1157_v30  ;;  %551 = vmatpush1.bf16.msra.mxu1 %v1158_v31  ;;  %v1229_v21 = vld [vmem:[#allocation8 + $0x98] sm:$0xff]   ;;  %v1233_v25 = vld [vmem:[#allocation8 + $0x90] sm:$0xff]   ;;  %v1235_v27 = vld [vmem:[#allocation8 + $0xc8] sm:$0xff]  }
  0x54   :  { %509 = vmatprep.subr.bf16.mxu0 %v1159_v32  ;;  %552 = vmatprep.subr.bf16.mxu1 %v1161_v33  ;;  %v1236_v28 = vld [vmem:[#allocation8 + $0x8] sm:$0xff]   ;;  %v1238_v30 = vld [vmem:[#allocation8 + $0x40] sm:$0xff]  }
  0x55   :  { %v1237_v29 = vld [vmem:[#allocation8 + $0x88] sm:$0xff]   ;;  %v1239_v31 = vld [vmem:[#allocation8 + $0xc0] sm:$0xff]  }
  0x56   :  { %v1240_v32 = vld [vmem:[#allocation8] sm:$0xff]  }
  0x57   :  { %510 = vmatpush2.bf16.msra.mxu0 %v1163_v34  ;;  %553 = vmatpush2.bf16.msra.mxu1 %v1164_v35  ;;  %v1241_v33 = vld [vmem:[#allocation8 + $0x80] sm:$0xff]   ;;  %v143_v34 = vlaneseq }
  0x58   :  { %511 = vmatprep.subr.bf16.mxu0 %v1165_v36  ;;  %554 = vmatprep.subr.bf16.mxu1 %v1167_v37 }
  0x59   :  { %v144_v35 = vshrl.u32 %v143_v34, 7 }
  0x5b   :  { %512 = vmatpush2.bf16.msra.mxu0 %v1169_v38  ;;  %555 = vmatpush2.bf16.msra.mxu1 %v1170_v39  ;;  %v149_v36 = vsub.s32 1, %v144_v35  ;;  %v157_v37 = vsub.s32 3, %v144_v35  ;;  %v145_v38 = vsub.s32 0, %v144_v35  ;;  %v153_v39 = vsub.s32 2, %v144_v35 }
  0x5c   :  { %513 = vmatprep.subr.bf16.mxu0 %v1171_v40  ;;  %556 = vmatprep.subr.bf16.mxu1 %v1173_v41  ;;  %v141_v40 = vld [vmem:[#allocation7] sm:$0xf] }
  0x5f   :  { %514 = vmatpush2.bf16.msra.mxu0 %v1175_v42  ;;  %557 = vmatpush2.bf16.msra.mxu1 %v1176_v43  ;;  %v150_v43 = vrot.slane %v141_v40, %v149_v36 }
  0x60   :  { %515 = vmatprep.subr.bf16.mxu0 %v1177_v44  ;;  %558 = vmatprep.subr.bf16.mxu1 %v1179_v45  ;;  %v158_v44 = vrot.slane %v141_v40, %v157_v37  ;;  %v146_v45 = vrot.slane %v141_v40, %v145_v38 }
  0x63   :  { %516 = vmatpush2.bf16.msra.mxu0 %v1181_v46  ;;  %559 = vmatpush2.bf16.msra.mxu1 %v1182_v47  ;;  %v154_v46 = vrot.slane %v141_v40, %v153_v39 }
  0x64   :  { %517 = vmatprep.subr.bf16.mxu0 %v1183_v49  ;;  %560 = vmatprep.subr.bf16.mxu1 %v1185_v50 }
  0x67   :  { %518 = vmatpush2.bf16.msra.mxu0 %v1187_v51  ;;  %561 = vmatpush2.bf16.msra.mxu1 %v1188_v52 }
  0x68   :  { %519 = vmatprep.subr.bf16.mxu0 %v1189_v53  ;;  %562 = vmatprep.subr.bf16.mxu1 %v1191_v54 }
  0x6b   :  { %520 = vmatpush2.bf16.msra.mxu0 %v1193_v55  ;;  %563 = vmatpush2.bf16.msra.mxu1 %v1194_v56 }
  0x6c   :  { %521 = vmatprep.subr.bf16.mxu0 %v1195_v57  ;;  %564 = vmatprep.subr.bf16.mxu1 %v1197_v58 }
  0x6f   :  { %522 = vmatpush2.bf16.msra.mxu0 %v1199_v59  ;;  %565 = vmatpush2.bf16.msra.mxu1 %v1200_v60 }
  0x70   :  { %523 = vmatprep.subr.bf16.mxu0 %v1201_v61  ;;  %566 = vmatprep.subr.bf16.mxu1 %v1203_v62 }
  0x73   :  { %524 = vmatpush2.bf16.msra.mxu0 %v1205_v63  ;;  %567 = vmatpush2.bf16.msra.mxu1 %v1206_v0 }
  0x74   :  { %1056 = vmatprep.subr.bf16.mxu0 %v1210_v1  ;;  %1078 = vmatprep.subr.bf16.mxu1 %v1211_v3 }
  0x76   :  { %526 = vmatmul.mubr.bf16.vlgmr.msra.gmra.mxu0 %v1207_v2  ;;  %569 = vmatmul.mubr.bf16.vlgmr.msra.gmra.mxu1 %v1207_v2 }
  0x77   :  { %1057 = vmatpush3.bf16.msra.mxu0 %v1212_v4  ;;  %1079 = vmatpush3.bf16.msra.mxu1 %v1213_v5 }
  0x78   :  { %1058 = vmatprep.subr.bf16.mxu0 %v1214_v6  ;;  %1080 = vmatprep.subr.bf16.mxu1 %v1215_v7 }
  0x7b   :  { %1059 = vmatpush3.bf16.msra.mxu0 %v1216_v8  ;;  %1081 = vmatpush3.bf16.msra.mxu1 %v1217_v9 }
  0x7c   :  { %1060 = vmatprep.subr.bf16.mxu0 %v1218_v10  ;;  %1082 = vmatprep.subr.bf16.mxu1 %v1219_v11  ;;  %v1023_v11 = vld [vmem:[%s1419_s4] ss:$0 sm:$0xff]  ;;  %s1322_s4 = scalar_lea.vmem %s944_s18, 256 }
  0x7d   :  { %p1323_p6 = scmp.ne.s32.totalorder %s944_s18, %s1322_s4  ;;  %p1328_p8 = scmp.lt.s32.totalorder %s1322_s4, %s1322_s4 }
  0x7f   :  { %1061 = vmatpush3.bf16.msra.mxu0 %v1220_v12  ;;  %1083 = vmatpush3.bf16.msra.mxu1 %v1221_v13  ;;  %p1329_p9 = por %p1328_p8, %p1327_p7 }
  0x80   :  { %1062 = vmatprep.subr.bf16.mxu0 %v1222_v14  ;;  %1084 = vmatprep.subr.bf16.mxu1 %v1223_v15 }
  0x81   :  { %p1330_p10 = pnand %p1329_p9, %p1323_p6 }
  0x83   :  { %1063 = vmatpush3.bf16.msra.mxu0 %v1224_v16  ;;  %1085 = vmatpush3.bf16.msra.mxu1 %v1225_v17 }
  0x84   :  { %1064 = vmatprep.subr.bf16.mxu0 %v1226_v18  ;;  %1086 = vmatprep.subr.bf16.mxu1 %v1227_v19 }
  0x87   :  { %1065 = vmatpush3.bf16.msra.mxu0 %v1228_v20  ;;  %1087 = vmatpush3.bf16.msra.mxu1 %v1229_v21 }
  0x88   :  { %1066 = vmatprep.subr.bf16.mxu0 %v1230_v22  ;;  %1088 = vmatprep.subr.bf16.mxu1 %v1231_v23 }
  0x8b   :  { %1067 = vmatpush3.bf16.msra.mxu0 %v1232_v24  ;;  %1089 = vmatpush3.bf16.msra.mxu1 %v1233_v25 }
  0x8c   :  { %1068 = vmatprep.subr.bf16.mxu0 %v1234_v26  ;;  %1090 = vmatprep.subr.bf16.mxu1 %v1235_v27 }
  0x8f   :  { %1069 = vmatpush3.bf16.msra.mxu0 %v1236_v28  ;;  %1091 = vmatpush3.bf16.msra.mxu1 %v1237_v29 }
  0x90   :  { %1070 = vmatprep.subr.bf16.mxu0 %v1238_v30  ;;  %1092 = vmatprep.subr.bf16.mxu1 %v1239_v31 }
  0x93   :  { %1071 = vmatpush3.bf16.msra.mxu0 %v1240_v32  ;;  %1093 = vmatpush3.bf16.msra.mxu1 %v1241_v33 }
 0x136   :  { %v527_v41 = vpop.f32.mrf.mxu0  ;;  %v570_v42 = vpop.f32.mrf.mxu1 }
 0x137   :  { %v528_v55 = vadd.f32 %v527_v41, %v146_v45  ;;  %v571_v56 = vadd.f32 %v570_v42, %v154_v46 }
 0x138   :  { %v529_v47 = vpop.f32.mrf.mxu0  ;;  %v572_v48 = vpop.f32.mrf.mxu1 }
 0x139   :  { %v530_v51 = vadd.f32 %v529_v47, %v150_v43  ;;  %v573_v52 = vadd.f32 %v572_v48, %v158_v44  ;;  %v579_v3 = vmax.f32 %v528_v55, 0.0  ;;  %v581_v4 = vmax.f32 %v571_v56, 0.0 }
 0x13a   :  { %v531_v49 = vpop.f32.mrf.mxu0  ;;  %v574_v50 = vpop.f32.mrf.mxu1 }
 0x13b   :  { %v532_v53 = vadd.f32 %v531_v49, %v146_v45  ;;  %v575_v54 = vadd.f32 %v574_v50, %v154_v46  ;;  %v580_v63 = vmax.f32 %v530_v51, 0.0  ;;  %v582_v0 = vmax.f32 %v573_v52, 0.0 }
 0x13c   :  { %v533_v57 = vpop.f32.mrf.mxu0  ;;  %v576_v58 = vpop.f32.mrf.mxu1 }
 0x13d   :  { %v534_v59 = vadd.f32 %v533_v57, %v150_v43  ;;  %v577_v60 = vadd.f32 %v576_v58, %v158_v44  ;;  %v583_v61 = vmax.f32 %v532_v53, 0.0  ;;  %v585_v62 = vmax.f32 %v575_v54, 0.0 }
 0x13f   :  { %v584_v1 = vmax.f32 %v534_v59, 0.0  ;;  %v586_v2 = vmax.f32 %v577_v60, 0.0  ;;  %v587_v7 = vpack.c.bf16 %v583_v61, %v579_v3  ;;  %v589_v8 = vpack.c.bf16 %v585_v62, %v581_v4 }
 0x141   :  { %v588_v5 = vpack.c.bf16 %v584_v1, %v580_v63  ;;  %v590_v6 = vpack.c.bf16 %v586_v2, %v582_v0 }
 0x143   :  { %886 = vmatprep.mubr.bf16.mxu0 %v588_v5  ;;  %927 = vmatprep.mubr.bf16.mxu1 %v590_v6 }
 0x144   :  { %887 = vmatmul.mubr.bf16.vlgmr.msra.gmra.mxu0 %v587_v7  ;;  %928 = vmatmul.mubr.bf16.vlgmr.msra.gmra.mxu1 %v589_v8 }
 0x204   :  { %v1072_v9 = vpop.f32.mrf.mxu0  ;;  %v1094_v10 = vpop.f32.mrf.mxu1 }
 0x206   :  { %v1073_v12 = vpop.f32.mrf.mxu0  ;;  %v1095_v13 = vpop.f32.mrf.mxu1 }
 0x207   :  { %v1074_v14 = vadd.f32 %v1073_v12, %v1072_v9  ;;  %v1096_v18 = vadd.f32 %v1095_v13, %v1094_v10 }
 0x208   :  { %v1075_v15 = vpop.f32.mrf.mxu0  ;;  %v1097_v16 = vpop.f32.mrf.mxu1 }
 0x209   :  { %v889_v17 = vadd.f32 %v1074_v14, %v1023_v11 }
 0x20a   :  { %v1076_v19 = vpop.f32.mrf.mxu0  ;;  %v1098_v20 = vpop.f32.mrf.mxu1 }
 0x20b   :  { %v930_v21 = vadd.f32 %v1096_v18, %v889_v17  ;;  %v1077_v22 = vadd.f32 %v1076_v19, %v1075_v15  ;;  %v1099_v24 = vadd.f32 %v1098_v20, %v1097_v16 }
 0x20d   :  { %936 = vst [vmem:[#allocation10] sm:$0xff] %v930_v21  ;;  %v892_v23 = vadd.f32 %v1077_v22, %v1023_v11 }
 0x20f   :  { %v933_v25 = vadd.f32 %v1099_v24, %v892_v23 }
 0x211   :  { %937 = vst [vmem:[#allocation10 + $0x8] sm:$0xff] %v933_v25 }
 0x212   :  { %1333 = shalt.err (!%p1330_p10)
}
 0x213   :  { %949 = dma.vmem_to_hbm [thread:$0]  %s944_s18, 256, %s1420_s5, [#allocation4], %s1354_s28, %s1354_s28, %s1355_s29  }
 0x214   :  { %1348 = dma.done.wait [#allocation4], 256  }
 0x215   :  { %1349 = vsyncadd [#allocation4], 4294967040 }
 0x216   :  { %953 = vsyncpa [#allocation3], 1 }
 0x217   :  { %954 = vsyncpa [#allocation6], 1 }
 0x218   :  { %955 = vsyncpa [#allocation9], 1 }
 0x219   :  { %956 = vsyncpa [#allocation4], 1 }

</bundles_post_ra>
